<compile_context>
chip_gen: v7x
topology: tpu7x:2x2x1
jax: 0.10.0
libtpu: 0.0.40
codegen_flags: <defaults>
</compile_context>

<pallas_src>
import functools

import jax
import jax.numpy as jnp
from jax import lax
from jax.experimental import pallas as pl
from jax.experimental.pallas import tpu as pltpu


def _round_up(n, m):
    return ((n + m - 1) // m) * m


# ----------------------------------------------------------------------------
# Kernel
# ----------------------------------------------------------------------------
def _make_kernel(num_hidden_layers, unroll_limit=4):
    L = num_hidden_layers

    def kernel(x_ref, w_in_ref, w_blk_ref, sh_ref, w_out_ref, b_out_ref, o_ref):
        # x_ref:     (block_b, d_in)        f32 (cast to mm_dtype in-kernel)
        # w_in_ref:  (d_in, H)              mm_dtype  (BN scale pre-folded)
        # w_blk_ref: (2L, H, H)             mm_dtype  [wa0, wb0, wa1, wb1, ...]
        # sh_ref:    (2L+1, 1, H)           f32       shifts only
        # w_out_ref: (H, d_out_pad)         mm_dtype
        # b_out_ref: (1, d_out_pad)         f32
        # o_ref:     (block_b, d_out_pad)   f32
        mm_dtype = w_in_ref.dtype

        # In-kernel cast (VPU, free under MXU slack) avoids a wrapper-side
        # cast op and an extra HBM round-trip of x.
        x = x_ref[...].astype(mm_dtype)

        # input_proj: Linear (scale folded into W) -> +shift -> ReLU.
        # Dropout = identity in eval mode.
        h = jnp.dot(x, w_in_ref[...], preferred_element_type=jnp.float32)
        h = jnp.maximum(h + sh_ref[0], 0.0)

        def block_step(l, h):
            wa = w_blk_ref[2 * l]
            wb = w_blk_ref[2 * l + 1]
            t = jnp.dot(h.astype(mm_dtype), wa, preferred_element_type=jnp.float32)
            t = jnp.maximum(t + sh_ref[1 + 2 * l], 0.0)
            t = jnp.dot(t.astype(mm_dtype), wb, preferred_element_type=jnp.float32)
            t = t + sh_ref[2 + 2 * l]
            return jnp.maximum(h + t, 0.0)              # f32 epilogue on VPU

        if L <= unroll_limit:
            for l in range(L):                           # static unroll, small L
                h = block_step(l, h)
        else:
            # Bounds live ranges / code size for deep residual stacks.
            h = lax.fori_loop(0, L, block_step, h)

        # output_layer: Linear with plain bias, lane-dense padded width.
        y = jnp.dot(h.astype(mm_dtype), w_out_ref[...],
                    preferred_element_type=jnp.float32)
        o_ref[...] = (y + b_out_ref[...]).astype(o_ref.dtype)

    return kernel


# ----------------------------------------------------------------------------
# One-time parameter preparation (hoisted out of the per-call path)
# ----------------------------------------------------------------------------
def prepare_params(params, num_hidden_layers=None, mm_dtype=jnp.bfloat16):
    """Fold BN scales into weights, stack/pad/cast once. Call once and reuse."""
    if num_hidden_layers is None:
        num_hidden_layers = len(params["blocks"])
    L = num_hidden_layers
    assert L >= 1, "at least one residual block expected"

    d_out = params["w_out"].shape[1]
    d_out_pad = _round_up(d_out, 128)          # lane-dense output store

    def fold(w, ss):
        scale, shift = ss[0], ss[1]
        return (w * scale[None, :]).astype(mm_dtype), shift.reshape(1, -1)

    w_in, sh_in = fold(params["w_in"], params["ss_in"])
    w_blk, shifts = [], [sh_in]
    for lyr in params["blocks"][:L]:
        wa, sha = fold(lyr["wa"], lyr["ssa"])
        wb, shb = fold(lyr["wb"], lyr["ssb"])
        w_blk += [wa, wb]
        shifts += [sha, shb]

    w_blk = jnp.stack(w_blk, axis=0)                            # (2L, H, H)
    shifts = jnp.stack(shifts, axis=0).astype(jnp.float32)      # (2L+1, 1, H)
    w_out = jnp.pad(params["w_out"],
                    ((0, 0), (0, d_out_pad - d_out))).astype(mm_dtype)
    b_out = jnp.pad(params["b_out"].reshape(1, -1),
                    ((0, 0), (0, d_out_pad - d_out))).astype(jnp.float32)

    return dict(num_hidden_layers=L, d_out=d_out,
                w_in=w_in, w_blk=w_blk, shifts=shifts, w_out=w_out, b_out=b_out)


# ----------------------------------------------------------------------------
# Forward wrapper
# ----------------------------------------------------------------------------
def ego_agent_nn_forward(x, prep, *, block_b_cap=512):
    """Fused EgoAgentNN forward. x: (B, D_INPUT) f32 -> (B, D_OUTPUT) f32."""
    w_in, w_blk, shifts = prep["w_in"], prep["w_blk"], prep["shifts"]
    w_out, b_out = prep["w_out"], prep["b_out"]
    L = prep["num_hidden_layers"]
    d_out = prep["d_out"]

    B, d_in = x.shape
    d_hidden = w_in.shape[1]
    d_out_pad = w_out.shape[1]

    # Batch tiling: one tile of up to `block_b_cap` rows.  Small batches get a
    # single grid step (no megacore split, weights DMA'd once per core); large
    # batches get >= 2 "parallel" steps so the x/out DMA pipelines and v7x can
    # shard whole tiles across its 2 TensorCores.
    B8 = _round_up(B, 8)
    block_b = min(B8, _round_up(block_b_cap, 8))
    grid = pl.cdiv(B8, block_b)
    B_pad = grid * block_b

    x = x.astype(jnp.float32)
    if B_pad != B:
        x = jnp.pad(x, ((0, B_pad - B), (0, 0)))

    def resident_spec(arr):
        nd = arr.ndim
        return pl.BlockSpec(arr.shape, lambda i, _nd=nd: (0,) * _nd)

    in_specs = [pl.BlockSpec((block_b, d_in), lambda i: (i, 0))]
    in_specs += [resident_spec(a) for a in (w_in, w_blk, shifts, w_out, b_out)]
    out_spec = pl.BlockSpec((block_b, d_out_pad), lambda i: (i, 0))

    flops = 2 * B_pad * (d_in * d_hidden
                         + 2 * L * d_hidden * d_hidden
                         + d_hidden * d_out_pad)
    bytes_accessed = (int(x.size) * x.dtype.itemsize
                      + sum(int(a.size) * a.dtype.itemsize
                            for a in (w_in, w_blk, shifts, w_out, b_out))
                      + int(B_pad) * d_out_pad * 4)

    out = pl.pallas_call(
        _make_kernel(L),
        out_shape=jax.ShapeDtypeStruct((B_pad, d_out_pad), jnp.float32),
        grid_spec=pltpu.PrefetchScalarGridSpec(
            num_scalar_prefetch=0,
            grid=(grid,),
            in_specs=in_specs,
            out_specs=out_spec,
        ),
        compiler_params=pltpu.CompilerParams(
            dimension_semantics=("parallel",),
        ),
        cost_estimate=pl.CostEstimate(
            flops=flops, transcendentals=0, bytes_accessed=bytes_accessed),
    )(x, w_in, w_blk, shifts, w_out, b_out)

    return out[:B, :d_out]


# ----------------------------------------------------------------------------
# Deterministic parameter construction (Linear + BatchNorm, scale/shift form)
# ----------------------------------------------------------------------------
def _fold_linear_bn(key, d_in, d_out, eps=1e-5):
    """Return (W, ss) where ss = [scale; shift] expresses Linear bias + BN."""
    k = jax.random.split(key, 6)
    w = jax.random.normal(k[0], (d_in, d_out), jnp.float32) * 0.05
    b = jax.random.normal(k[1], (d_out,), jnp.float32) * 0.05
    gamma = 1.0 + 0.1 * jax.random.normal(k[2], (d_out,), jnp.float32)
    beta = 0.1 * jax.random.normal(k[3], (d_out,), jnp.float32)
    mean = 0.1 * jax.random.normal(k[4], (d_out,), jnp.float32)
    var = jnp.abs(jax.random.normal(k[5], (d_out,), jnp.float32)) + 0.5
    scale = gamma / jnp.sqrt(var + eps)
    shift = (b - mean) * scale + beta
    ss = jnp.stack([scale, shift], axis=0)  # (2, d_out)
    return w, ss


def make_params(key, d_input, d_hidden, d_output, num_hidden_layers):
    keys = jax.random.split(key, 2 + 2 * num_hidden_layers + 2)
    w_in, ss_in = _fold_linear_bn(keys[0], d_input, d_hidden)
    blocks = []
    for l in range(num_hidden_layers):
        wa, ssa = _fold_linear_bn(keys[1 + 2 * l], d_hidden, d_hidden)
        wb, ssb = _fold_linear_bn(keys[2 + 2 * l], d_hidden, d_hidden)
        blocks.append(dict(wa=wa, ssa=ssa, wb=wb, ssb=ssb))
    ko = keys[-1]
    k1, k2 = jax.random.split(ko)
    w_out = jax.random.normal(k1, (d_hidden, d_output), jnp.float32) * 0.05
    b_out = (0.05 * jax.random.normal(k2, (d_output,), jnp.float32)).reshape(1, -1)
    return dict(w_in=w_in, ss_in=ss_in, blocks=blocks, w_out=w_out, b_out=b_out)


def reference_forward(x, params):
    """Pure-JAX reference (same math as the PyTorch eval-mode forward)."""
    h = x @ params["w_in"]
    h = h * params["ss_in"][0:1] + params["ss_in"][1:2]
    h = jnp.maximum(h, 0.0)
    for lyr in params["blocks"]:
        t = h @ lyr["wa"]
        t = t * lyr["ssa"][0:1] + lyr["ssa"][1:2]
        t = jnp.maximum(t, 0.0)
        t = t @ lyr["wb"]
        t = t * lyr["ssb"][0:1] + lyr["ssb"][1:2]
        h = jnp.maximum(h + t, 0.0)
    return h @ params["w_out"] + params["b_out"]


# ----------------------------------------------------------------------------
if __name__ == "__main__":
    config = {
        "D_INPUT": 32,
        "D_HIDDEN": 128,
        "D_OUTPUT": 16,
        "DROPOUT": 0.1,          # identity in eval mode
        "NUM_HIDDEN_LAYERS": 2,
    }
    B = 128

    key = jax.random.PRNGKey(0)
    kx, kp = jax.random.split(key)
    x = jax.random.normal(kx, (B, config["D_INPUT"]), jnp.float32)
    params = make_params(
        kp, config["D_INPUT"], config["D_HIDDEN"], config["D_OUTPUT"],
        config["NUM_HIDDEN_LAYERS"],
    )
    ref = reference_forward(x, params)

    # ---- f32 MXU path: tight check vs the pure-JAX reference ---------------
    prep_f32 = prepare_params(params, config["NUM_HIDDEN_LAYERS"],
                              mm_dtype=jnp.float32)
    fwd_f32 = jax.jit(lambda a: ego_agent_nn_forward(a, prep_f32))
    out = jax.block_until_ready(fwd_f32(x))
    assert out.shape == (B, config["D_OUTPUT"])
    assert jnp.allclose(out, ref, rtol=5e-4, atol=5e-4), "f32 mismatch vs reference"

    # ---- ragged batch (exercises padding path) ------------------------------
    Br = 100
    out_r = jax.block_until_ready(fwd_f32(x[:Br]))
    assert out_r.shape == (Br, config["D_OUTPUT"])
    assert jnp.allclose(out_r, ref[:Br], rtol=5e-4, atol=5e-4), "ragged-batch mismatch"

    # ---- bf16 default path (MXU-native feeds, f32 accumulation/epilogue) ----
    prep_bf16 = prepare_params(params, config["NUM_HIDDEN_LAYERS"])  # bf16 default
    fwd_bf16 = jax.jit(lambda a: ego_agent_nn_forward(a, prep_bf16))
    out_bf16 = jax.block_until_ready(fwd_bf16(x))
    assert out_bf16.shape == (B, config["D_OUTPUT"])
    assert jnp.allclose(out_bf16, ref, rtol=5e-2, atol=5e-2), "bf16 mismatch vs reference"

    print("KERNEL_OK")
</pallas_src>

<mosaic_0001>
module attributes {stable_mosaic.version = 11 : i64} {
  func.func @kernel(%arg0: i32, %arg1: memref<128x32xf32, #tpu.memory_space<vmem>>, %arg2: memref<32x128xf32, #tpu.memory_space<vmem>>, %arg3: memref<4x128x128xf32, #tpu.memory_space<vmem>>, %arg4: memref<5x1x128xf32, #tpu.memory_space<vmem>>, %arg5: memref<128x128xf32, #tpu.memory_space<vmem>>, %arg6: memref<1x128xf32, #tpu.memory_space<vmem>>, %arg7: memref<128x128xf32, #tpu.memory_space<vmem>>) attributes {dimension_semantics = [#tpu.dimension_semantics<parallel>], iteration_bounds = array<i64: 1>, scalar_prefetch = 0 : i64, scratch_operands = 0 : i64, tpu.core_type = #tpu.core_type<tc>, window_params = [{transform_indices = @transform_0, window_bounds = array<i64: 128, 32>}, {pipeline_mode = #tpu.pipeline_mode<synchronous>, transform_indices = @transform_1, window_bounds = array<i64: 32, 128>}, {pipeline_mode = #tpu.pipeline_mode<synchronous>, transform_indices = @transform_2, window_bounds = array<i64: 4, 128, 128>}, {pipeline_mode = #tpu.pipeline_mode<synchronous>, transform_indices = @transform_3, window_bounds = array<i64: 5, 1, 128>}, {pipeline_mode = #tpu.pipeline_mode<synchronous>, transform_indices = @transform_4, window_bounds = array<i64: 128, 128>}, {pipeline_mode = #tpu.pipeline_mode<synchronous>, transform_indices = @transform_5, window_bounds = array<i64: 1, 128>}, {transform_indices = @transform_6, window_bounds = array<i64: 128, 128>}]} {
    %c0 = arith.constant 0 : index
    %c0_0 = arith.constant 0 : index
    %0 = vector.load %arg1[%c0, %c0_0] : memref<128x32xf32, #tpu.memory_space<vmem>>, vector<128x32xf32>
    %c0_1 = arith.constant 0 : index
    %c0_2 = arith.constant 0 : index
    %1 = vector.load %arg2[%c0_1, %c0_2] : memref<32x128xf32, #tpu.memory_space<vmem>>, vector<32x128xf32>
    %cst = arith.constant dense<0.000000e+00> : vector<128x128xf32>
    %2 = tpu.matmul %0, %1, %cst {dimension_numbers = #tpu.dot_dimension_numbers<[1], [0], [0], [1], [0, 0, 1, 1], [], []>} : vector<128x32xf32>, vector<32x128xf32>, vector<128x128xf32> -> vector<128x128xf32>
    %c0_3 = arith.constant 0 : index
    %c0_4 = arith.constant 0 : index
    %c0_5 = arith.constant 0 : index
    %3 = vector.load %arg4[%c0_3, %c0_4, %c0_5] : memref<5x1x128xf32, #tpu.memory_space<vmem>>, vector<1x1x128xf32>
    %4 = vector.shape_cast %3 : vector<1x1x128xf32> to vector<1x128xf32>
    %5 = vector.broadcast %4 : vector<1x128xf32> to vector<128x128xf32>
    %6 = arith.addf %2, %5 : vector<128x128xf32>
    %cst_6 = arith.constant 0.000000e+00 : f32
    %7 = vector.broadcast %cst_6 : f32 to vector<128x128xf32>
    %8 = arith.maximumf %6, %7 : vector<128x128xf32>
    %c0_7 = arith.constant 0 : index
    %c0_8 = arith.constant 0 : index
    %c0_9 = arith.constant 0 : index
    %9 = vector.load %arg3[%c0_7, %c0_8, %c0_9] : memref<4x128x128xf32, #tpu.memory_space<vmem>>, vector<1x128x128xf32>
    %10 = vector.shape_cast %9 : vector<1x128x128xf32> to vector<128x128xf32>
    %c1 = arith.constant 1 : index
    %c0_10 = arith.constant 0 : index
    %c0_11 = arith.constant 0 : index
    %11 = vector.load %arg3[%c1, %c0_10, %c0_11] : memref<4x128x128xf32, #tpu.memory_space<vmem>>, vector<1x128x128xf32>
    %12 = vector.shape_cast %11 : vector<1x128x128xf32> to vector<128x128xf32>
    %cst_12 = arith.constant dense<0.000000e+00> : vector<128x128xf32>
    %13 = tpu.matmul %8, %10, %cst_12 {dimension_numbers = #tpu.dot_dimension_numbers<[1], [0], [0], [1], [0, 0, 1, 1], [], []>} : vector<128x128xf32>, vector<128x128xf32>, vector<128x128xf32> -> vector<128x128xf32>
    %c1_13 = arith.constant 1 : index
    %c0_14 = arith.constant 0 : index
    %c0_15 = arith.constant 0 : index
    %14 = vector.load %arg4[%c1_13, %c0_14, %c0_15] : memref<5x1x128xf32, #tpu.memory_space<vmem>>, vector<1x1x128xf32>
    %15 = vector.shape_cast %14 : vector<1x1x128xf32> to vector<1x128xf32>
    %16 = vector.broadcast %15 : vector<1x128xf32> to vector<128x128xf32>
    %17 = arith.addf %13, %16 : vector<128x128xf32>
    %cst_16 = arith.constant 0.000000e+00 : f32
    %18 = vector.broadcast %cst_16 : f32 to vector<128x128xf32>
    %19 = arith.maximumf %17, %18 : vector<128x128xf32>
    %cst_17 = arith.constant dense<0.000000e+00> : vector<128x128xf32>
    %20 = tpu.matmul %19, %12, %cst_17 {dimension_numbers = #tpu.dot_dimension_numbers<[1], [0], [0], [1], [0, 0, 1, 1], [], []>} : vector<128x128xf32>, vector<128x128xf32>, vector<128x128xf32> -> vector<128x128xf32>
    %c2 = arith.constant 2 : index
    %c0_18 = arith.constant 0 : index
    %c0_19 = arith.constant 0 : index
    %21 = vector.load %arg4[%c2, %c0_18, %c0_19] : memref<5x1x128xf32, #tpu.memory_space<vmem>>, vector<1x1x128xf32>
    %22 = vector.shape_cast %21 : vector<1x1x128xf32> to vector<1x128xf32>
    %23 = vector.broadcast %22 : vector<1x128xf32> to vector<128x128xf32>
    %24 = arith.addf %20, %23 : vector<128x128xf32>
    %25 = arith.addf %8, %24 : vector<128x128xf32>
    %cst_20 = arith.constant 0.000000e+00 : f32
    %26 = vector.broadcast %cst_20 : f32 to vector<128x128xf32>
    %27 = arith.maximumf %25, %26 : vector<128x128xf32>
    %c2_21 = arith.constant 2 : index
    %c0_22 = arith.constant 0 : index
    %c0_23 = arith.constant 0 : index
    %28 = vector.load %arg3[%c2_21, %c0_22, %c0_23] : memref<4x128x128xf32, #tpu.memory_space<vmem>>, vector<1x128x128xf32>
    %29 = vector.shape_cast %28 : vector<1x128x128xf32> to vector<128x128xf32>
    %c3 = arith.constant 3 : index
    %c0_24 = arith.constant 0 : index
    %c0_25 = arith.constant 0 : index
    %30 = vector.load %arg3[%c3, %c0_24, %c0_25] : memref<4x128x128xf32, #tpu.memory_space<vmem>>, vector<1x128x128xf32>
    %31 = vector.shape_cast %30 : vector<1x128x128xf32> to vector<128x128xf32>
    %cst_26 = arith.constant dense<0.000000e+00> : vector<128x128xf32>
    %32 = tpu.matmul %27, %29, %cst_26 {dimension_numbers = #tpu.dot_dimension_numbers<[1], [0], [0], [1], [0, 0, 1, 1], [], []>} : vector<128x128xf32>, vector<128x128xf32>, vector<128x128xf32> -> vector<128x128xf32>
    %c3_27 = arith.constant 3 : index
    %c0_28 = arith.constant 0 : index
    %c0_29 = arith.constant 0 : index
    %33 = vector.load %arg4[%c3_27, %c0_28, %c0_29] : memref<5x1x128xf32, #tpu.memory_space<vmem>>, vector<1x1x128xf32>
    %34 = vector.shape_cast %33 : vector<1x1x128xf32> to vector<1x128xf32>
    %35 = vector.broadcast %34 : vector<1x128xf32> to vector<128x128xf32>
    %36 = arith.addf %32, %35 : vector<128x128xf32>
    %cst_30 = arith.constant 0.000000e+00 : f32
    %37 = vector.broadcast %cst_30 : f32 to vector<128x128xf32>
    %38 = arith.maximumf %36, %37 : vector<128x128xf32>
    %cst_31 = arith.constant dense<0.000000e+00> : vector<128x128xf32>
    %39 = tpu.matmul %38, %31, %cst_31 {dimension_numbers = #tpu.dot_dimension_numbers<[1], [0], [0], [1], [0, 0, 1, 1], [], []>} : vector<128x128xf32>, vector<128x128xf32>, vector<128x128xf32> -> vector<128x128xf32>
    %c4 = arith.constant 4 : index
    %c0_32 = arith.constant 0 : index
    %c0_33 = arith.constant 0 : index
    %40 = vector.load %arg4[%c4, %c0_32, %c0_33] : memref<5x1x128xf32, #tpu.memory_space<vmem>>, vector<1x1x128xf32>
    %41 = vector.shape_cast %40 : vector<1x1x128xf32> to vector<1x128xf32>
    %42 = vector.broadcast %41 : vector<1x128xf32> to vector<128x128xf32>
    %43 = arith.addf %39, %42 : vector<128x128xf32>
    %44 = arith.addf %27, %43 : vector<128x128xf32>
    %cst_34 = arith.constant 0.000000e+00 : f32
    %45 = vector.broadcast %cst_34 : f32 to vector<128x128xf32>
    %46 = arith.maximumf %44, %45 : vector<128x128xf32>
    %c0_35 = arith.constant 0 : index
    %c0_36 = arith.constant 0 : index
    %47 = vector.load %arg5[%c0_35, %c0_36] : memref<128x128xf32, #tpu.memory_space<vmem>>, vector<128x128xf32>
    %cst_37 = arith.constant dense<0.000000e+00> : vector<128x128xf32>
    %48 = tpu.matmul %46, %47, %cst_37 {dimension_numbers = #tpu.dot_dimension_numbers<[1], [0], [0], [1], [0, 0, 1, 1], [], []>} : vector<128x128xf32>, vector<128x128xf32>, vector<128x128xf32> -> vector<128x128xf32>
    %c0_38 = arith.constant 0 : index
    %c0_39 = arith.constant 0 : index
    %49 = vector.load %arg6[%c0_38, %c0_39] : memref<1x128xf32, #tpu.memory_space<vmem>>, vector<1x128xf32>
    %50 = vector.broadcast %49 : vector<1x128xf32> to vector<128x128xf32>
    %51 = arith.addf %48, %50 : vector<128x128xf32>
    %c0_40 = arith.constant 0 : index
    %c0_41 = arith.constant 0 : index
    %52 = vector.load %arg7[%c0_40, %c0_41] : memref<128x128xf32, #tpu.memory_space<vmem>>, vector<128x128xf32>
    tpu.vector_store %arg7[%c0_40, %c0_41], %51 {strides = array<i32>} : memref<128x128xf32, #tpu.memory_space<vmem>>, vector<128x128xf32>,
    return
  }
  func.func @transform_0(%arg0: i32) -> (i32, i32) {
    %c0_i32 = arith.constant 0 : i32
    %c0_i32_0 = arith.constant 0 : i32
    return %arg0, %c0_i32 : i32, i32
  }
  func.func @transform_1(%arg0: i32) -> (i32, i32) {
    %c0_i32 = arith.constant 0 : i32
    %c0_i32_0 = arith.constant 0 : i32
    %c0_i32_1 = arith.constant 0 : i32
    return %c0_i32, %c0_i32_0 : i32, i32
  }
  func.func @transform_2(%arg0: i32) -> (i32, i32, i32) {
    %c0_i32 = arith.constant 0 : i32
    %c0_i32_0 = arith.constant 0 : i32
    %c0_i32_1 = arith.constant 0 : i32
    %c0_i32_2 = arith.constant 0 : i32
    return %c0_i32, %c0_i32_0, %c0_i32_1 : i32, i32, i32
  }
  func.func @transform_3(%arg0: i32) -> (i32, i32, i32) {
    %c0_i32 = arith.constant 0 : i32
    %c0_i32_0 = arith.constant 0 : i32
    %c0_i32_1 = arith.constant 0 : i32
    %c0_i32_2 = arith.constant 0 : i32
    return %c0_i32, %c0_i32_0, %c0_i32_1 : i32, i32, i32
  }
  func.func @transform_4(%arg0: i32) -> (i32, i32) {
    %c0_i32 = arith.constant 0 : i32
    %c0_i32_0 = arith.constant 0 : i32
    %c0_i32_1 = arith.constant 0 : i32
    return %c0_i32, %c0_i32_0 : i32, i32
  }
  func.func @transform_5(%arg0: i32) -> (i32, i32) {
    %c0_i32 = arith.constant 0 : i32
    %c0_i32_0 = arith.constant 0 : i32
    %c0_i32_1 = arith.constant 0 : i32
    return %c0_i32, %c0_i32_0 : i32, i32
  }
  func.func @transform_6(%arg0: i32) -> (i32, i32) {
    %c0_i32 = arith.constant 0 : i32
    %c0_i32_0 = arith.constant 0 : i32
    return %arg0, %c0_i32 : i32, i32
  }
}

</mosaic_0001>

<bundles_post_ra>
// kernel: _lambda_.1
= control target key start
LH: loop header
LB: loop body
LE: loop exit
PB: predicated region body
PF: predicated region fallthrough
CT: control target
= control target key end

     0   :  { %11 = vsyncpa [#allocation3], 0  ;;  %s1967_s21 = smov [#allocation2]   ;;  %s2497_s0 = inlined_call_operand.vmem [shape: f32[128,32], index: 0, kind: input, shape index: {}]   ;;  %s2498_s1 = inlined_call_operand.vmem [shape: f32[32,128], index: 1, kind: input, shape index: {}]   ;;  %s2499_s2 = inlined_call_operand.hbm [shape: f32[4,128,128], index: 2, kind: input, shape index: {}]   ;;  %s2500_s3 = inlined_call_operand.vmem [shape: f32[5,1,128], index: 3, kind: input, shape index: {}]   ;;  %s2501_s4 = inlined_call_operand.vmem [shape: f32[128,128], index: 4, kind: input, shape index: {}]   ;;  %s2502_s5 = inlined_call_operand.vmem [shape: f32[1,128], index: 5, kind: input, shape index: {}]   ;;  %s2503_s6 = inlined_call_operand.vmem [shape: f32[128,128], index: 6, kind: output, shape index: {}]  }
   0x1   :  { %s21_s22 = sshll.u32 %s1967_s21, 4  ;;  %s1943_s25 = scalar_lea.hbm %s2499_s2, 8192  ;;  %s22_s22 = int_to_ptr.vmem [resolvable:$true] %s21_s22 }
   0x2   :  { %p1944_p0 = scmp.ne.s32.totalorder %s2499_s2, %s1943_s25  ;;  %p1947_p1 = scmp.lt.u32.totalorder %s1943_s25, %s2499_s2 }
   0x4   :  { %p1949_p2 = pnand %p1947_p1, %p1944_p0 }
   0x6   :  { %1952 = shalt.err (!%p1949_p2)
}
   0x7   :  { %s1953_s30 = scalar_lea.vmem %s22_s22, 8192  ;;  %p1958_p4 = scmp.lt.s32.totalorder %s22_s22, %s22_s22 }
   0x8   :  { %p1954_p3 = scmp.ne.s32.totalorder %s22_s22, %s1953_s30  ;;  %p1959_p5 = scmp.lt.s32.totalorder %s1953_s30, %s1953_s30 }
   0xa   :  { %p1960_p6 = por %p1959_p5, %p1958_p4 }
   0xc   :  { %p1961_p7 = pnand %p1960_p6, %p1954_p3 }
   0xe   :  { %1964 = shalt.err (!%p1961_p7)
}
   0xf   :  { %s1968_s7 = smov 128   ;;  %s1969_s8 = smov 8  }
  0x10   :  { %27 = dma.hbm_to_vmem [thread:$0]  %s2499_s2, 8192, %s22_s22, [#allocation3], %s1968_s7, %s1968_s7, %s1969_s8  }
  0x11   :  { %1965 = dma.done.wait [#allocation3], 8192  }
  0x12   :  { %1966 = vsyncadd [#allocation3], 4294959104  ;;  %vm64_vm0 = vcmask 261120   ;;  %v53_v0 = vld [vmem:[%s2498_s1] sm:$0xff]  ;;  %v54_v1 = vld [vmem:[%s2498_s1 + $0x8] sm:$0xff] }
  0x13   :  { %v55_v2 = vld [vmem:[%s2498_s1 + $0x10] sm:$0xff]  ;;  %v1756_v3 = vpack.c.bf16 %v54_v1, %v53_v0  ;;  %v56_v4 = vld [vmem:[%s2498_s1 + $0x18] sm:$0xff]  ;;  %v37_v5 = vld [vmem:[%s2497_s0] sm:$0xff] }
  0x14   :  { %v1760_v6 = vpack.c.bf16 %v56_v4, %v55_v2  ;;  %1452 = vmatprep.mubr.msk.f32.mxu0 %vm64_vm0, %v37_v5  ;;  %v274_v7 = vld [vmem:[#allocation2] sm:$0xff]  ;;  %v275_v8 = vld [vmem:[#allocation2 + $0x8] sm:$0xff]  ;;  %v276_v9 = vld [vmem:[#allocation2 + $0x10] sm:$0xff] }
  0x15   :  { %1757 = vmatprep.subr.bf16.mxu0 %v1756_v3  ;;  %v277_v10 = vld [vmem:[#allocation2 + $0x18] sm:$0xff]  ;;  %v38_v11 = vld [vmem:[%s2497_s0 + $0x8] sm:$0xff]  ;;  %v1764_v12 = vpack.c.bf16 %v275_v8, %v274_v7  ;;  %v39_v14 = vld [vmem:[%s2497_s0 + $0x10] sm:$0xff] }
  0x16   :  { %1759 = vmatpush3.bf16.msra.mxu0 %v1756_v3  ;;  %v1768_v13 = vpack.c.bf16 %v277_v10, %v276_v9  ;;  %v278_v15 = vld [vmem:[#allocation2 + $0x20] sm:$0xff]  ;;  %v279_v16 = vld [vmem:[#allocation2 + $0x28] sm:$0xff]  ;;  %v40_v17 = vld [vmem:[%s2497_s0 + $0x18] sm:$0xff] }
  0x17   :  { %1761 = vmatprep.subr.bf16.mxu0 %v1760_v6  ;;  %1765 = vmatprep.subr.bf16.mxu1 %v1764_v12  ;;  %v1772_v18 = vpack.c.bf16 %v279_v16, %v278_v15  ;;  %v41_v19 = vld [vmem:[%s2497_s0 + $0x20] sm:$0xff]  ;;  %v280_v20 = vld [vmem:[#allocation2 + $0x30] sm:$0xff]  ;;  %v281_v21 = vld [vmem:[#allocation2 + $0x38] sm:$0xff] }
  0x18   :  { %1767 = vmatpush3.bf16.msra.mxu1 %v1764_v12  ;;  %v42_v22 = vld [vmem:[%s2497_s0 + $0x28] sm:$0xff]  ;;  %v1776_v23 = vpack.c.bf16 %v281_v21, %v280_v20  ;;  %v43_v24 = vld [vmem:[%s2497_s0 + $0x30] sm:$0xff]  ;;  %v282_v25 = vld [vmem:[#allocation2 + $0x40] sm:$0xff] }
  0x19   :  { %1769 = vmatprep.subr.bf16.mxu1 %v1768_v13  ;;  %v283_v26 = vld [vmem:[#allocation2 + $0x48] sm:$0xff]  ;;  %v44_v27 = vld [vmem:[%s2497_s0 + $0x38] sm:$0xff]  ;;  %v45_v29 = vld [vmem:[%s2497_s0 + $0x40] sm:$0xff] }
  0x1a   :  { %1763 = vmatpush3.bf16.msra.mxu0 %v1760_v6  ;;  %v1780_v28 = vpack.c.bf16 %v283_v26, %v282_v25  ;;  %v284_v30 = vld [vmem:[#allocation2 + $0x50] sm:$0xff]  ;;  %v285_v31 = vld [vmem:[#allocation2 + $0x58] sm:$0xff]  ;;  %v46_v32 = vld [vmem:[%s2497_s0 + $0x48] sm:$0xff] }
  0x1b   :  { %v1784_v33 = vpack.c.bf16 %v285_v31, %v284_v30  ;;  %v47_v34 = vld [vmem:[%s2497_s0 + $0x50] sm:$0xff]  ;;  %v286_v35 = vld [vmem:[#allocation2 + $0x60] sm:$0xff]  ;;  %v287_v36 = vld [vmem:[#allocation2 + $0x68] sm:$0xff] }
  0x1c   :  { %1771 = vmatpush3.bf16.msra.mxu1 %v1768_v13  ;;  %v48_v37 = vld [vmem:[%s2497_s0 + $0x58] sm:$0xff]  ;;  %v1788_v38 = vpack.c.bf16 %v287_v36, %v286_v35  ;;  %v49_v39 = vld [vmem:[%s2497_s0 + $0x60] sm:$0xff]  ;;  %v50_v40 = vld [vmem:[%s2497_s0 + $0x68] sm:$0xff] }
  0x1d   :  { %1453 = vmatmul.mubr.msk.f32.vlgmr.msra.gmra.mrb[0].mxu0 %vm64_vm0, %v38_v11  ;;  %1773 = vmatprep.subr.bf16.mxu1 %v1772_v18  ;;  %v51_v41 = vld [vmem:[%s2497_s0 + $0x70] sm:$0xff]  ;;  %v52_v42 = vld [vmem:[%s2497_s0 + $0x78] sm:$0xff]  ;;  %v291_v46 = vld [vmem:[#allocation2 + $0x80] sm:$0xff] }
  0x1e   :  { %1455 = vmatprep.mubr.msk.f32.mxu0 %vm64_vm0, %v39_v14  ;;  %v288_v43 = vld [vmem:[#allocation2 + $0x70] sm:$0xff]  ;;  %v289_v44 = vld [vmem:[#allocation2 + $0x78] sm:$0xff]  ;;  %v292_v47 = vld [vmem:[#allocation2 + $0x88] sm:$0xff] }
  0x1f   :  { %v1792_v45 = vpack.c.bf16 %v289_v44, %v288_v43  ;;  %v293_v48 = vld [vmem:[#allocation2 + $0x90] sm:$0xff]  ;;  %v1796_v49 = vpack.c.bf16 %v292_v47, %v291_v46  ;;  %v294_v50 = vld [vmem:[#allocation2 + $0x98] sm:$0xff]  ;;  %v295_v52 = vld [vmem:[#allocation2 + $0xa0] sm:$0xff] }
  0x20   :  { %1775 = vmatpush3.bf16.msra.mxu1 %v1772_v18  ;;  %v1800_v51 = vpack.c.bf16 %v294_v50, %v293_v48  ;;  %v296_v53 = vld [vmem:[#allocation2 + $0xa8] sm:$0xff]  ;;  %v297_v55 = vld [vmem:[#allocation2 + $0xb0] sm:$0xff]  ;;  %v298_v56 = vld [vmem:[#allocation2 + $0xb8] sm:$0xff] }
  0x21   :  { %1456 = vmatmul.mubr.msk.f32.gmra.mrb[2].mxu0 %vm64_vm0, %v40_v17  ;;  %1777 = vmatprep.subr.bf16.mxu1 %v1776_v23  ;;  %v1804_v54 = vpack.c.bf16 %v296_v53, %v295_v52  ;;  %v1808_v57 = vpack.c.bf16 %v298_v56, %v297_v55  ;;  %v299_v58 = vld [vmem:[#allocation2 + $0xc0] sm:$0xff]  ;;  %v300_v59 = vld [vmem:[#allocation2 + $0xc8] sm:$0xff]  ;;  %v301_v61 = vld [vmem:[#allocation2 + $0xd0] sm:$0xff] }
  0x22   :  { %1458 = vmatprep.mubr.msk.f32.mxu0 %vm64_vm0, %v41_v19  ;;  %1797 = vmatprep.subr.bf16.mxu0 %v1796_v49  ;;  %v1812_v60 = vpack.c.bf16 %v300_v59, %v299_v58  ;;  %v302_v62 = vld [vmem:[#allocation2 + $0xd8] sm:$0xff]  ;;  %v303_v0 = vld [vmem:[#allocation2 + $0xe0] sm:$0xff]  ;;  %v304_v1 = vld [vmem:[#allocation2 + $0xe8] sm:$0xff] }
  0x23   :  { %1799 = vmatpush3.bf16.msra.mxu0 %v1796_v49  ;;  %v1816_v63 = vpack.c.bf16 %v302_v62, %v301_v61  ;;  %v1820_v2 = vpack.c.bf16 %v304_v1, %v303_v0  ;;  %v1238_v3 = vld [vmem:[%s2500_s3] ss:$0 sm:$0xff]  ;;  %v305_v52 = vld [vmem:[#allocation2 + $0xf0] sm:$0xff]  ;;  %v306_v53 = vld [vmem:[#allocation2 + $0xf8] sm:$0xff] }
  0x24   :  { %1779 = vmatpush3.bf16.msra.mxu1 %v1776_v23  ;;  %1801 = vmatprep.subr.bf16.mxu0 %v1800_v51  ;;  %v662_v55 = vld [vmem:[#allocation2 + $0x100] sm:$0xff]  ;;  %v663_v56 = vld [vmem:[#allocation2 + $0x108] sm:$0xff]  ;;  %v665_v59 = vld [vmem:[#allocation2 + $0x118] sm:$0xff] }
  0x25   :  { %1459 = vmatmul.mubr.msk.f32.gmra.mrb[4].mxu0 %vm64_vm0, %v42_v22  ;;  %1781 = vmatprep.subr.bf16.mxu1 %v1780_v28  ;;  %v1828_v58 = vpack.c.bf16 %v663_v56, %v662_v55  ;;  %v666_v61 = vld [vmem:[#allocation2 + $0x120] sm:$0xff]  ;;  %v667_v62 = vld [vmem:[#allocation2 + $0x128] sm:$0xff]  ;;  %v668_v0 = vld [vmem:[#allocation2 + $0x130] sm:$0xff] }
  0x26   :  { %1461 = vmatprep.mubr.msk.f32.mxu0 %vm64_vm0, %v43_v24  ;;  %v669_v1 = vld [vmem:[#allocation2 + $0x138] sm:$0xff] }
  0x27   :  { %1803 = vmatpush3.bf16.msra.mxu0 %v1800_v51 }
  0x28   :  { %1783 = vmatpush3.bf16.msra.mxu1 %v1780_v28  ;;  %1805 = vmatprep.subr.bf16.mxu0 %v1804_v54 }
  0x29   :  { %1462 = vmatmul.mubr.msk.f32.gmra.mrb[6].mxu0 %vm64_vm0, %v44_v27  ;;  %1785 = vmatprep.subr.bf16.mxu1 %v1784_v33 }
  0x2a   :  { %1464 = vmatprep.mubr.msk.f32.mxu0 %vm64_vm0, %v45_v29 }
  0x2b   :  { %1807 = vmatpush3.bf16.msra.mxu0 %v1804_v54  ;;  %v1824_v54 = vpack.c.bf16 %v306_v53, %v305_v52 }
  0x2c   :  { %1787 = vmatpush3.bf16.msra.mxu1 %v1784_v33  ;;  %1809 = vmatprep.subr.bf16.mxu0 %v1808_v57 }
  0x2d   :  { %1465 = vmatmul.mubr.msk.f32.gmra.mrb[8].mxu0 %vm64_vm0, %v46_v32  ;;  %1789 = vmatprep.subr.bf16.mxu1 %v1788_v38 }
  0x2e   :  { %1467 = vmatprep.mubr.msk.f32.mxu0 %vm64_vm0, %v47_v34 }
  0x2f   :  { %1811 = vmatpush3.bf16.msra.mxu0 %v1808_v57  ;;  %v664_v57 = vld [vmem:[#allocation2 + $0x110] sm:$0xff] }
  0x30   :  { %1791 = vmatpush3.bf16.msra.mxu1 %v1788_v38  ;;  %1813 = vmatprep.subr.bf16.mxu0 %v1812_v60 }
  0x31   :  { %1468 = vmatmul.mubr.msk.f32.gmra.mrb[10].mxu0 %vm64_vm0, %v48_v37  ;;  %1793 = vmatprep.subr.bf16.mxu1 %v1792_v45 }
  0x32   :  { %1470 = vmatprep.mubr.msk.f32.mxu0 %vm64_vm0, %v49_v39 }
  0x33   :  { %1815 = vmatpush3.bf16.msra.mxu0 %v1812_v60  ;;  %v1832_v60 = vpack.c.bf16 %v665_v59, %v664_v57 }
  0x34   :  { %1795 = vmatpush3.bf16.msra.mxu1 %v1792_v45  ;;  %1817 = vmatprep.subr.bf16.mxu0 %v1816_v63 }
  0x35   :  { %1471 = vmatmul.mubr.msk.f32.gmra.mrb[12].mxu0 %vm64_vm0, %v50_v40  ;;  %1829 = vmatprep.subr.bf16.mxu1 %v1828_v58 }
  0x36   :  { %1473 = vmatprep.mubr.msk.f32.mxu0 %vm64_vm0, %v51_v41 }
  0x37   :  { %1819 = vmatpush3.bf16.msra.mxu0 %v1816_v63  ;;  %v1836_v63 = vpack.c.bf16 %v667_v62, %v666_v61 }
  0x38   :  { %1821 = vmatprep.subr.bf16.mxu0 %v1820_v2 }
  0x39   :  { %1474 = vmatmul.mubr.msk.f32.gmra.mrb[14].mxu0 %vm64_vm0, %v52_v42 }
  0x3b   :  { %1823 = vmatpush3.bf16.msra.mxu0 %v1820_v2  ;;  %v1840_v2 = vpack.c.bf16 %v669_v1, %v668_v0 }
  0x3c   :  { %1825 = vmatprep.subr.bf16.mxu0 %v1824_v54 }
  0x3f   :  { %1827 = vmatpush3.bf16.msra.mxu0 %v1824_v54 }
  0xf0   :  { %v1454_v4 = vpop.f32.mrb[0].mxu0 }
  0xf1   :  { %v2096_v5 = vadd.f32 %v1454_v4, %v1238_v3  ;;  %v179_v6 = vpop.f32.mrb[1].mxu0  ;;  %v671_v4 = vld [vmem:[#allocation2 + $0x148] sm:$0xff] }
  0xf2   :  { %v2098_v7 = vadd.f32 %v1238_v3, %v179_v6 }
  0xf3   :  { %v259_v10 = vmax.f32 %v2096_v5, 0.0 }
  0xf4   :  { %v258_v8 = vmax.f32 %v2098_v7, 0.0  ;;  %v1457_v9 = vpop.f32.mrb[2].mxu0 }
  0xf5   :  { %v2102_v11 = vadd.f32 %v1457_v9, %v1238_v3  ;;  %v189_v12 = vpop.f32.mrb[3].mxu0  ;;  %v672_v9 = vld [vmem:[#allocation2 + $0x150] sm:$0xff] }
  0xf6   :  { %v2104_v13 = vadd.f32 %v1238_v3, %v189_v12  ;;  %1508 = vmatprep.mubr.f32.mxu1 %v258_v8  ;;  %v673_v12 = vld [vmem:[#allocation2 + $0x158] sm:$0xff] }
  0xf7   :  { %1509 = vmatmul.mubr.f32.vlgmr.msra.gmra.mrb[0].mxu1 %v259_v10  ;;  %v261_v16 = vmax.f32 %v2102_v11, 0.0 }
  0xf8   :  { %v260_v14 = vmax.f32 %v2104_v13, 0.0  ;;  %v1460_v15 = vpop.f32.mrb[4].mxu0  ;;  %1831 = vmatpush3.bf16.msra.mxu1 %v1828_v58 }
  0xf9   :  { %v2112_v17 = vadd.f32 %v1460_v15, %v1238_v3  ;;  %v199_v18 = vpop.f32.mrb[5].mxu0  ;;  %1833 = vmatprep.subr.bf16.mxu1 %v1832_v60  ;;  %v1848_v15 = vpack.c.bf16 %v673_v12, %v672_v9 }
  0xfa   :  { %v2114_v19 = vadd.f32 %v1238_v3, %v199_v18  ;;  %1511 = vmatprep.mubr.f32.mxu1 %v260_v14  ;;  %v1256_v18 = vld [vmem:[%s2500_s3 + $0x1] ss:$0 sm:$0xff] }
  0xfb   :  { %1512 = vmatmul.mubr.f32.gmra.mrb[2].mxu1 %v261_v16  ;;  %v263_v22 = vmax.f32 %v2112_v17, 0.0 }
  0xfc   :  { %v262_v20 = vmax.f32 %v2114_v19, 0.0  ;;  %v1463_v21 = vpop.f32.mrb[6].mxu0  ;;  %1835 = vmatpush3.bf16.msra.mxu1 %v1832_v60 }
  0xfd   :  { %v2122_v23 = vadd.f32 %v1463_v21, %v1238_v3  ;;  %v209_v24 = vpop.f32.mrb[7].mxu0  ;;  %1837 = vmatprep.subr.bf16.mxu1 %v1836_v63 }
  0xfe   :  { %v2124_v25 = vadd.f32 %v1238_v3, %v209_v24  ;;  %1514 = vmatprep.mubr.f32.mxu1 %v262_v20 }
  0xff   :  { %1515 = vmatmul.mubr.f32.gmra.mrb[4].mxu1 %v263_v22  ;;  %v265_v28 = vmax.f32 %v2122_v23, 0.0 }
 0x100   :  { %v264_v26 = vmax.f32 %v2124_v25, 0.0  ;;  %v1466_v27 = vpop.f32.mrb[8].mxu0  ;;  %1839 = vmatpush3.bf16.msra.mxu1 %v1836_v63 }
 0x101   :  { %v2132_v29 = vadd.f32 %v1466_v27, %v1238_v3  ;;  %v219_v30 = vpop.f32.mrb[9].mxu0  ;;  %1841 = vmatprep.subr.bf16.mxu1 %v1840_v2 }
 0x102   :  { %v2134_v31 = vadd.f32 %v1238_v3, %v219_v30  ;;  %1517 = vmatprep.mubr.f32.mxu1 %v264_v26 }
 0x103   :  { %1518 = vmatmul.mubr.f32.gmra.mrb[6].mxu1 %v265_v28  ;;  %v267_v34 = vmax.f32 %v2132_v29, 0.0 }
 0x104   :  { %v266_v32 = vmax.f32 %v2134_v31, 0.0  ;;  %v1469_v33 = vpop.f32.mrb[10].mxu0  ;;  %1843 = vmatpush3.bf16.msra.mxu1 %v1840_v2 }
 0x105   :  { %v2142_v35 = vadd.f32 %v1469_v33, %v1238_v3  ;;  %v229_v36 = vpop.f32.mrb[11].mxu0 }
 0x106   :  { %v2144_v37 = vadd.f32 %v1238_v3, %v229_v36  ;;  %1520 = vmatprep.mubr.f32.mxu1 %v266_v32 }
 0x107   :  { %1521 = vmatmul.mubr.f32.gmra.mrb[8].mxu1 %v267_v34  ;;  %v269_v40 = vmax.f32 %v2142_v35, 0.0 }
 0x108   :  { %v268_v38 = vmax.f32 %v2144_v37, 0.0  ;;  %v1472_v39 = vpop.f32.mrb[12].mxu0 }
 0x109   :  { %v2152_v41 = vadd.f32 %v1472_v39, %v1238_v3  ;;  %v239_v42 = vpop.f32.mrb[13].mxu0 }
 0x10a   :  { %v2154_v43 = vadd.f32 %v1238_v3, %v239_v42  ;;  %1523 = vmatprep.mubr.f32.mxu1 %v268_v38 }
 0x10b   :  { %1524 = vmatmul.mubr.f32.gmra.mrb[10].mxu1 %v269_v40  ;;  %v271_v46 = vmax.f32 %v2152_v41, 0.0 }
 0x10c   :  { %v270_v44 = vmax.f32 %v2154_v43, 0.0  ;;  %v1475_v45 = vpop.f32.mrb[14].mxu0 }
 0x10d   :  { %v2162_v47 = vadd.f32 %v1475_v45, %v1238_v3  ;;  %v249_v48 = vpop.f32.mrb[15].mxu0 }
 0x10e   :  { %v2164_v49 = vadd.f32 %v1238_v3, %v249_v48  ;;  %1526 = vmatprep.mubr.f32.mxu1 %v270_v44  ;;  %v670_v3 = vld [vmem:[#allocation2 + $0x140] sm:$0xff] }
 0x10f   :  { %1527 = vmatmul.mubr.f32.gmra.mrb[12].mxu1 %v271_v46  ;;  %v273_v51 = vmax.f32 %v2162_v47, 0.0  ;;  %v1844_v6 = vpack.c.bf16 %v671_v4, %v670_v3  ;;  %v693_v47 = vld [vmem:[#allocation2 + $0x1f0] sm:$0xff] }
 0x110   :  { %v272_v50 = vmax.f32 %v2164_v49, 0.0  ;;  %v694_v49 = vld [vmem:[#allocation2 + $0x1f8] sm:$0xff] }
 0x111   :  { %1845 = vmatprep.subr.bf16.mxu1 %v1844_v6 }
 0x112   :  { %1529 = vmatprep.mubr.f32.mxu1 %v272_v50  ;;  %1847 = vmatpush3.bf16.msra.mxu1 %v1844_v6 }
 0x113   :  { %1530 = vmatmul.mubr.f32.gmra.mrb[14].mxu1 %v273_v51  ;;  %1849 = vmatprep.subr.bf16.mxu1 %v1848_v15 }
 0x116   :  { %1851 = vmatpush3.bf16.msra.mxu1 %v1848_v15 }
 0x1ca   :  { %v1510_v21 = vpop.f32.mrb[0].mxu1 }
 0x1cb   :  { %v387_v24 = vadd.f32 %v1510_v21, %v1256_v18  ;;  %v381_v27 = vpop.f32.mrb[1].mxu1 }
 0x1cc   :  { %v382_v30 = vadd.f32 %v1256_v18, %v381_v27 }
 0x1cd   :  { %v461_v39 = vmax.f32 %v387_v24, 0.0 }
 0x1ce   :  { %v460_v33 = vmax.f32 %v382_v30, 0.0  ;;  %v1513_v36 = vpop.f32.mrb[2].mxu1 }
 0x1cf   :  { %v397_v42 = vadd.f32 %v1513_v36, %v1256_v18  ;;  %v391_v45 = vpop.f32.mrb[3].mxu1 }
 0x1d0   :  { %v392_v48 = vadd.f32 %v1256_v18, %v391_v45  ;;  %1564 = vmatprep.mubr.f32.mxu0 %v460_v33 }
 0x1d1   :  { %1565 = vmatmul.mubr.f32.vlgmr.msra.gmra.mrb[16].mxu0 %v461_v39  ;;  %v463_v54 = vmax.f32 %v397_v42, 0.0 }
 0x1d2   :  { %v462_v52 = vmax.f32 %v392_v48, 0.0  ;;  %v1516_v53 = vpop.f32.mrb[4].mxu1 }
 0x1d3   :  { %v407_v55 = vadd.f32 %v1516_v53, %v1256_v18  ;;  %v401_v56 = vpop.f32.mrb[5].mxu1 }
 0x1d4   :  { %v402_v57 = vadd.f32 %v1256_v18, %v401_v56  ;;  %1567 = vmatprep.mubr.f32.mxu0 %v462_v52 }
 0x1d5   :  { %1568 = vmatmul.mubr.f32.gmra.mrb[18].mxu0 %v463_v54  ;;  %v465_v60 = vmax.f32 %v407_v55, 0.0 }
 0x1d6   :  { %v464_v58 = vmax.f32 %v402_v57, 0.0  ;;  %v1519_v59 = vpop.f32.mrb[6].mxu1 }
 0x1d7   :  { %v417_v61 = vadd.f32 %v1519_v59, %v1256_v18  ;;  %v411_v62 = vpop.f32.mrb[7].mxu1  ;;  %v674_v59 = vld [vmem:[#allocation2 + $0x160] sm:$0xff] }
 0x1d8   :  { %v412_v63 = vadd.f32 %v1256_v18, %v411_v62  ;;  %1570 = vmatprep.mubr.f32.mxu0 %v464_v58  ;;  %v676_v62 = vld [vmem:[#allocation2 + $0x170] sm:$0xff] }
 0x1d9   :  { %1571 = vmatmul.mubr.f32.gmra.mrb[20].mxu0 %v465_v60  ;;  %v467_v2 = vmax.f32 %v417_v61, 0.0  ;;  %v675_v60 = vld [vmem:[#allocation2 + $0x168] sm:$0xff] }
 0x1da   :  { %v466_v0 = vmax.f32 %v412_v63, 0.0  ;;  %v1522_v1 = vpop.f32.mrb[8].mxu1  ;;  %v1852_v61 = vpack.c.bf16 %v675_v60, %v674_v59  ;;  %v677_v63 = vld [vmem:[#allocation2 + $0x178] sm:$0xff] }
 0x1db   :  { %v427_v3 = vadd.f32 %v1522_v1, %v1256_v18  ;;  %v421_v4 = vpop.f32.mrb[9].mxu1  ;;  %v679_v1 = vld [vmem:[#allocation2 + $0x180] sm:$0xff] }
 0x1dc   :  { %v422_v6 = vadd.f32 %v1256_v18, %v421_v4  ;;  %1573 = vmatprep.mubr.f32.mxu0 %v466_v0  ;;  %1853 = vmatprep.subr.bf16.mxu1 %v1852_v61  ;;  %v1856_v0 = vpack.c.bf16 %v677_v63, %v676_v62  ;;  %v682_v4 = vld [vmem:[#allocation2 + $0x198] sm:$0xff] }
 0x1dd   :  { %1574 = vmatmul.mubr.f32.gmra.mrb[22].mxu0 %v467_v2  ;;  %v469_v15 = vmax.f32 %v427_v3, 0.0  ;;  %1855 = vmatpush3.bf16.msra.mxu1 %v1852_v61  ;;  %v680_v2 = vld [vmem:[#allocation2 + $0x188] sm:$0xff]  ;;  %v681_v3 = vld [vmem:[#allocation2 + $0x190] sm:$0xff] }
 0x1de   :  { %v468_v9 = vmax.f32 %v422_v6, 0.0  ;;  %v1525_v12 = vpop.f32.mrb[10].mxu1  ;;  %1857 = vmatprep.subr.bf16.mxu1 %v1856_v0  ;;  %v1864_v6 = vpack.c.bf16 %v682_v4, %v681_v3 }
 0x1df   :  { %v437_v21 = vadd.f32 %v1525_v12, %v1256_v18  ;;  %v431_v24 = vpop.f32.mrb[11].mxu1  ;;  %v684_v12 = vld [vmem:[#allocation2 + $0x1a8] sm:$0xff] }
 0x1e0   :  { %v432_v27 = vadd.f32 %v1256_v18, %v431_v24  ;;  %1576 = vmatprep.mubr.f32.mxu0 %v468_v9  ;;  %v683_v9 = vld [vmem:[#allocation2 + $0x1a0] sm:$0xff]  ;;  %v686_v24 = vld [vmem:[#allocation2 + $0x1b8] sm:$0xff] }
 0x1e1   :  { %1577 = vmatmul.mubr.f32.gmra.mrb[24].mxu0 %v469_v15  ;;  %v471_v36 = vmax.f32 %v437_v21, 0.0  ;;  %1859 = vmatpush3.bf16.msra.mxu1 %v1856_v0  ;;  %v1868_v15 = vpack.c.bf16 %v684_v12, %v683_v9  ;;  %v685_v21 = vld [vmem:[#allocation2 + $0x1b0] sm:$0xff] }
 0x1e2   :  { %v470_v30 = vmax.f32 %v432_v27, 0.0  ;;  %v1528_v33 = vpop.f32.mrb[12].mxu1  ;;  %v1872_v27 = vpack.c.bf16 %v686_v24, %v685_v21 }
 0x1e3   :  { %v447_v39 = vadd.f32 %v1528_v33, %v1256_v18  ;;  %v441_v42 = vpop.f32.mrb[13].mxu1  ;;  %v688_v33 = vld [vmem:[#allocation2 + $0x1c8] sm:$0xff] }
 0x1e4   :  { %v442_v45 = vadd.f32 %v1256_v18, %v441_v42  ;;  %1579 = vmatprep.mubr.f32.mxu0 %v470_v30  ;;  %v687_v30 = vld [vmem:[#allocation2 + $0x1c0] sm:$0xff]  ;;  %v690_v42 = vld [vmem:[#allocation2 + $0x1d8] sm:$0xff] }
 0x1e5   :  { %1580 = vmatmul.mubr.f32.gmra.mrb[26].mxu0 %v471_v36  ;;  %v473_v53 = vmax.f32 %v447_v39, 0.0  ;;  %v1876_v36 = vpack.c.bf16 %v688_v33, %v687_v30  ;;  %v689_v39 = vld [vmem:[#allocation2 + $0x1d0] sm:$0xff] }
 0x1e6   :  { %v472_v48 = vmax.f32 %v442_v45, 0.0  ;;  %v1531_v52 = vpop.f32.mrb[14].mxu1  ;;  %v1880_v45 = vpack.c.bf16 %v690_v42, %v689_v39 }
 0x1e7   :  { %v457_v54 = vadd.f32 %v1531_v52, %v1256_v18  ;;  %v451_v55 = vpop.f32.mrb[15].mxu1  ;;  %v692_v52 = vld [vmem:[#allocation2 + $0x1e8] sm:$0xff] }
 0x1e8   :  { %v452_v56 = vadd.f32 %v1256_v18, %v451_v55  ;;  %1582 = vmatprep.mubr.f32.mxu0 %v472_v48  ;;  %v1860_v18 = vpack.c.bf16 %v680_v2, %v679_v1  ;;  %v691_v48 = vld [vmem:[#allocation2 + $0x1e0] sm:$0xff] }
 0x1e9   :  { %1583 = vmatmul.mubr.f32.gmra.mrb[28].mxu0 %v473_v53  ;;  %v475_v58 = vmax.f32 %v457_v54, 0.0  ;;  %v1884_v53 = vpack.c.bf16 %v692_v52, %v691_v48  ;;  %v2182_v54 = vld [vmem:[%s2500_s3 + $0x2] ss:$0 sm:$0xff] }
 0x1ea   :  { %v474_v57 = vmax.f32 %v452_v56, 0.0  ;;  %1861 = vmatprep.subr.bf16.mxu0 %v1860_v18 }
 0x1eb   :  { %1863 = vmatpush3.bf16.msra.mxu0 %v1860_v18 }
 0x1ec   :  { %1585 = vmatprep.mubr.f32.mxu0 %v474_v57  ;;  %1865 = vmatprep.subr.bf16.mxu0 %v1864_v6 }
 0x1ed   :  { %1586 = vmatmul.mubr.f32.gmra.mrb[30].mxu0 %v475_v58 }
 0x1ef   :  { %1867 = vmatpush3.bf16.msra.mxu0 %v1864_v6 }
 0x1f0   :  { %1869 = vmatprep.subr.bf16.mxu0 %v1868_v15 }
 0x1f3   :  { %1871 = vmatpush3.bf16.msra.mxu0 %v1868_v15 }
 0x1f4   :  { %1873 = vmatprep.subr.bf16.mxu0 %v1872_v27 }
 0x1f7   :  { %1875 = vmatpush3.bf16.msra.mxu0 %v1872_v27 }
 0x1f8   :  { %1877 = vmatprep.subr.bf16.mxu0 %v1876_v36 }
 0x1fb   :  { %1879 = vmatpush3.bf16.msra.mxu0 %v1876_v36 }
 0x1fc   :  { %1881 = vmatprep.subr.bf16.mxu0 %v1880_v45 }
 0x1ff   :  { %1883 = vmatpush3.bf16.msra.mxu0 %v1880_v45 }
 0x200   :  { %1885 = vmatprep.subr.bf16.mxu0 %v1884_v53 }
 0x203   :  { %1887 = vmatpush3.bf16.msra.mxu0 %v1884_v53 }
 0x2a4   :  { %v1566_v55 = vpop.f32.mrb[16].mxu0 }
 0x2a5   :  { %v556_v56 = vadd.f32 %v1566_v55, %v2182_v54  ;;  %v550_v57 = vpop.f32.mrb[17].mxu0 }
 0x2a6   :  { %v551_v58 = vadd.f32 %v2182_v54, %v550_v57 }
 0x2a7   :  { %v2188_v59 = vadd.f32 %v556_v56, %v259_v10 }
 0x2a8   :  { %v2192_v60 = vadd.f32 %v551_v58, %v258_v8  ;;  %v1569_v61 = vpop.f32.mrb[18].mxu0 }
 0x2a9   :  { %v566_v62 = vadd.f32 %v1569_v61, %v2182_v54  ;;  %v560_v63 = vpop.f32.mrb[19].mxu0  ;;  %v646_v2 = vmax.f32 %v2188_v59, 0.0  ;;  %v1050_v61 = vld [vmem:[%s2501_s4 + $0x8] sm:$0xff] }
 0x2aa   :  { %v645_v0 = vmax.f32 %v2192_v60, 0.0  ;;  %v561_v1 = vadd.f32 %v2182_v54, %v560_v63 }
 0x2ab   :  { %v2200_v3 = vadd.f32 %v566_v62, %v261_v16  ;;  %v1051_v62 = vld [vmem:[%s2501_s4 + $0x10] sm:$0xff] }
 0x2ac   :  { %v2204_v5 = vadd.f32 %v561_v1, %v260_v14  ;;  %v1572_v7 = vpop.f32.mrb[20].mxu0  ;;  %1620 = vmatprep.mubr.f32.mxu1 %v645_v0  ;;  %v1052_v1 = vld [vmem:[%s2501_s4 + $0x18] sm:$0xff] }
 0x2ad   :  { %v576_v8 = vadd.f32 %v1572_v7, %v2182_v54  ;;  %v570_v10 = vpop.f32.mrb[21].mxu0  ;;  %1621 = vmatmul.mubr.f32.vlgmr.msra.gmra.mrb[16].mxu1 %v646_v2  ;;  %v648_v16 = vmax.f32 %v2200_v3, 0.0  ;;  %v1896_v7 = vpack.c.bf16 %v1052_v1, %v1051_v62 }
 0x2ae   :  { %v647_v18 = vmax.f32 %v2204_v5, 0.0  ;;  %v571_v11 = vadd.f32 %v2182_v54, %v570_v10  ;;  %v1054_v10 = vld [vmem:[%s2501_s4 + $0x28] sm:$0xff] }
 0x2af   :  { %v2216_v13 = vadd.f32 %v576_v8, %v263_v22  ;;  %v1053_v8 = vld [vmem:[%s2501_s4 + $0x20] sm:$0xff] }
 0x2b0   :  { %v2220_v14 = vadd.f32 %v571_v11, %v262_v20  ;;  %v1575_v4 = vpop.f32.mrb[22].mxu0  ;;  %1623 = vmatprep.mubr.f32.mxu1 %v647_v18  ;;  %v1900_v11 = vpack.c.bf16 %v1054_v10, %v1053_v8 }
 0x2b1   :  { %v586_v6 = vadd.f32 %v1575_v4, %v2182_v54  ;;  %v580_v9 = vpop.f32.mrb[23].mxu0  ;;  %1624 = vmatmul.mubr.f32.gmra.mrb[18].mxu1 %v648_v16  ;;  %v650_v22 = vmax.f32 %v2216_v13, 0.0  ;;  %v1055_v4 = vld [vmem:[%s2501_s4 + $0x30] sm:$0xff] }
 0x2b2   :  { %v649_v12 = vmax.f32 %v2220_v14, 0.0  ;;  %v581_v17 = vadd.f32 %v2182_v54, %v580_v9 }
 0x2b3   :  { %v2232_v19 = vadd.f32 %v586_v6, %v265_v28  ;;  %v1056_v6 = vld [vmem:[%s2501_s4 + $0x38] sm:$0xff] }
 0x2b4   :  { %v2236_v20 = vadd.f32 %v581_v17, %v264_v26  ;;  %v1578_v15 = vpop.f32.mrb[24].mxu0  ;;  %1626 = vmatprep.mubr.f32.mxu1 %v649_v12  ;;  %v1904_v9 = vpack.c.bf16 %v1056_v6, %v1055_v4  ;;  %v1057_v17 = vld [vmem:[%s2501_s4 + $0x40] sm:$0xff] }
 0x2b5   :  { %v596_v21 = vadd.f32 %v1578_v15, %v2182_v54  ;;  %v590_v24 = vpop.f32.mrb[25].mxu0  ;;  %1627 = vmatmul.mubr.f32.gmra.mrb[20].mxu1 %v650_v22  ;;  %v652_v28 = vmax.f32 %v2232_v19, 0.0  ;;  %v1058_v15 = vld [vmem:[%s2501_s4 + $0x48] sm:$0xff] }
 0x2b6   :  { %v651_v27 = vmax.f32 %v2236_v20, 0.0  ;;  %v591_v23 = vadd.f32 %v2182_v54, %v590_v24  ;;  %v1059_v24 = vld [vmem:[%s2501_s4 + $0x50] sm:$0xff] }
 0x2b7   :  { %v2248_v25 = vadd.f32 %v596_v21, %v267_v34  ;;  %v2342_v21 = vpack.c.bf16 %v1058_v15, %v1057_v17 }
 0x2b8   :  { %v2252_v26 = vadd.f32 %v591_v23, %v266_v32  ;;  %v1581_v30 = vpop.f32.mrb[26].mxu0  ;;  %1629 = vmatprep.mubr.f32.mxu1 %v651_v27  ;;  %v1060_v23 = vld [vmem:[%s2501_s4 + $0x58] sm:$0xff] }
 0x2b9   :  { %v606_v33 = vadd.f32 %v1581_v30, %v2182_v54  ;;  %v600_v36 = vpop.f32.mrb[27].mxu0  ;;  %1630 = vmatmul.mubr.f32.gmra.mrb[22].mxu1 %v652_v28  ;;  %v654_v34 = vmax.f32 %v2248_v25, 0.0  ;;  %v2351_v30 = vpack.c.bf16 %v1060_v23, %v1059_v24 }
 0x2ba   :  { %v653_v39 = vmax.f32 %v2252_v26, 0.0  ;;  %v601_v29 = vadd.f32 %v2182_v54, %v600_v36 }
 0x2bb   :  { %v2264_v31 = vadd.f32 %v606_v33, %v269_v40  ;;  %v2359_v33 = vld [vmem:[%s2500_s3 + $0x3] ss:$0 sm:$0xff] }
 0x2bc   :  { %v2268_v32 = vadd.f32 %v601_v29, %v268_v38  ;;  %v1584_v42 = vpop.f32.mrb[28].mxu0  ;;  %1632 = vmatprep.mubr.f32.mxu1 %v653_v39 }
 0x2bd   :  { %v616_v45 = vadd.f32 %v1584_v42, %v2182_v54  ;;  %v610_v48 = vpop.f32.mrb[29].mxu0  ;;  %1633 = vmatmul.mubr.f32.gmra.mrb[24].mxu1 %v654_v34  ;;  %v656_v40 = vmax.f32 %v2264_v31, 0.0 }
 0x2be   :  { %v655_v52 = vmax.f32 %v2268_v32, 0.0  ;;  %v611_v35 = vadd.f32 %v2182_v54, %v610_v48 }
 0x2bf   :  { %v2280_v37 = vadd.f32 %v616_v45, %v271_v46 }
 0x2c0   :  { %v2284_v38 = vadd.f32 %v611_v35, %v270_v44  ;;  %v1587_v53 = vpop.f32.mrb[30].mxu0  ;;  %1635 = vmatprep.mubr.f32.mxu1 %v655_v52 }
 0x2c1   :  { %v626_v55 = vadd.f32 %v1587_v53, %v2182_v54  ;;  %v620_v56 = vpop.f32.mrb[31].mxu0  ;;  %1636 = vmatmul.mubr.f32.gmra.mrb[26].mxu1 %v656_v40  ;;  %v658_v46 = vmax.f32 %v2280_v37, 0.0 }
 0x2c2   :  { %v657_v57 = vmax.f32 %v2284_v38, 0.0  ;;  %v621_v41 = vadd.f32 %v2182_v54, %v620_v56 }
 0x2c3   :  { %v2296_v43 = vadd.f32 %v626_v55, %v273_v51  ;;  %v1049_v51 = vld [vmem:[%s2501_s4] sm:$0xff] }
 0x2c4   :  { %v2300_v44 = vadd.f32 %v621_v41, %v272_v50  ;;  %1638 = vmatprep.mubr.f32.mxu1 %v657_v57  ;;  %v1888_v50 = vpack.c.bf16 %v694_v49, %v693_v47  ;;  %v1892_v63 = vpack.c.bf16 %v1050_v61, %v1049_v51 }
 0x2c5   :  { %1639 = vmatmul.mubr.f32.gmra.mrb[28].mxu1 %v658_v46  ;;  %v660_v54 = vmax.f32 %v2296_v43, 0.0 }
 0x2c6   :  { %v659_v58 = vmax.f32 %v2300_v44, 0.0  ;;  %1889 = vmatprep.subr.bf16.mxu0 %v1888_v50  ;;  %1924 = vmatprep.subr.bf16.mxu1 %v1892_v63 }
 0x2c7   :  { %1891 = vmatpush3.bf16.msra.mxu0 %v1888_v50  ;;  %1932 = vmatpush3.bf16.msra.mxu1 %v1892_v63 }
 0x2c8   :  { %1641 = vmatprep.mubr.f32.mxu1 %v659_v58  ;;  %1893 = vmatprep.subr.bf16.mxu0 %v1892_v63 }
 0x2c9   :  { %1642 = vmatmul.mubr.f32.gmra.mrb[30].mxu1 %v660_v54  ;;  %1925 = vmatprep.subr.bf16.mxu1 %v1896_v7 }
 0x2cb   :  { %1933 = vmatpush3.bf16.msra.mxu1 %v1896_v7 }
 0x2cc   :  { %1926 = vmatprep.subr.bf16.mxu1 %v1900_v11 }
 0x2cf   :  { %1934 = vmatpush3.bf16.msra.mxu1 %v1900_v11 }
 0x2d0   :  { %1927 = vmatprep.subr.bf16.mxu1 %v1904_v9 }
 0x2d3   :  { %1935 = vmatpush3.bf16.msra.mxu1 %v1904_v9 }
 0x2d4   :  { %1928 = vmatprep.subr.bf16.mxu1 %v2342_v21 }
 0x2d7   :  { %1936 = vmatpush3.bf16.msra.mxu1 %v2342_v21 }
 0x2d8   :  { %1929 = vmatprep.subr.bf16.mxu1 %v2351_v30 }
 0x2db   :  { %1937 = vmatpush3.bf16.msra.mxu1 %v2351_v30 }
 0x380   :  { %v1622_v36 = vpop.f32.mrb[16].mxu1 }
 0x381   :  { %v775_v29 = vadd.f32 %v1622_v36, %v2359_v33  ;;  %v769_v42 = vpop.f32.mrb[17].mxu1 }
 0x382   :  { %v770_v45 = vadd.f32 %v2359_v33, %v769_v42 }
 0x383   :  { %v849_v53 = vmax.f32 %v775_v29, 0.0 }
 0x384   :  { %v848_v48 = vmax.f32 %v770_v45, 0.0  ;;  %v1625_v35 = vpop.f32.mrb[18].mxu1 }
 0x385   :  { %v785_v55 = vadd.f32 %v1625_v35, %v2359_v33  ;;  %v779_v56 = vpop.f32.mrb[19].mxu1 }
 0x386   :  { %v780_v41 = vadd.f32 %v2359_v33, %v779_v56  ;;  %1676 = vmatprep.mubr.f32.mxu0 %v848_v48 }
 0x387   :  { %1677 = vmatmul.mubr.f32.vlgmr.msra.gmra.mrb[32].mxu0 %v849_v53  ;;  %v851_v50 = vmax.f32 %v785_v55, 0.0 }
 0x388   :  { %v850_v47 = vmax.f32 %v780_v41, 0.0  ;;  %v1628_v49 = vpop.f32.mrb[20].mxu1  ;;  %1895 = vmatpush3.bf16.msra.mxu0 %v1892_v63 }
 0x389   :  { %v795_v51 = vadd.f32 %v1628_v49, %v2359_v33  ;;  %v789_v61 = vpop.f32.mrb[21].mxu1  ;;  %1897 = vmatprep.subr.bf16.mxu0 %v1896_v7 }
 0x38a   :  { %v790_v62 = vadd.f32 %v2359_v33, %v789_v61  ;;  %1679 = vmatprep.mubr.f32.mxu0 %v850_v47 }
 0x38b   :  { %1680 = vmatmul.mubr.f32.gmra.mrb[34].mxu0 %v851_v50  ;;  %v853_v10 = vmax.f32 %v795_v51, 0.0 }
 0x38c   :  { %v852_v1 = vmax.f32 %v790_v62, 0.0  ;;  %v1631_v8 = vpop.f32.mrb[22].mxu1  ;;  %1899 = vmatpush3.bf16.msra.mxu0 %v1896_v7 }
 0x38d   :  { %v805_v4 = vadd.f32 %v1631_v8, %v2359_v33  ;;  %v799_v6 = vpop.f32.mrb[23].mxu1  ;;  %1901 = vmatprep.subr.bf16.mxu0 %v1900_v11 }
 0x38e   :  { %v800_v17 = vadd.f32 %v2359_v33, %v799_v6  ;;  %1682 = vmatprep.mubr.f32.mxu0 %v852_v1  ;;  %v1064_v6 = vld [vmem:[%s2501_s4 + $0x78] sm:$0xff] }
 0x38f   :  { %1683 = vmatmul.mubr.f32.gmra.mrb[36].mxu0 %v853_v10  ;;  %v855_v24 = vmax.f32 %v805_v4, 0.0  ;;  %v1061_v10 = vld [vmem:[%s2501_s4 + $0x60] sm:$0xff] }
 0x390   :  { %v854_v63 = vmax.f32 %v800_v17, 0.0  ;;  %v1634_v15 = vpop.f32.mrb[24].mxu1  ;;  %1903 = vmatpush3.bf16.msra.mxu0 %v1900_v11 }
 0x391   :  { %v815_v23 = vadd.f32 %v1634_v15, %v2359_v33  ;;  %v809_v36 = vpop.f32.mrb[25].mxu1  ;;  %1905 = vmatprep.subr.bf16.mxu0 %v1904_v9 }
 0x392   :  { %v810_v29 = vadd.f32 %v2359_v33, %v809_v36  ;;  %1685 = vmatprep.mubr.f32.mxu0 %v854_v63  ;;  %v2396_v63 = vld [vmem:[%s2500_s3 + $0x4] ss:$0 sm:$0xff] }
 0x393   :  { %1686 = vmatmul.mubr.f32.gmra.mrb[38].mxu0 %v855_v24  ;;  %v857_v45 = vmax.f32 %v815_v23, 0.0 }
 0x394   :  { %v856_v7 = vmax.f32 %v810_v29, 0.0  ;;  %v1637_v42 = vpop.f32.mrb[26].mxu1  ;;  %1907 = vmatpush3.bf16.msra.mxu0 %v1904_v9 }
 0x395   :  { %v825_v48 = vadd.f32 %v1637_v42, %v2359_v33  ;;  %v819_v35 = vpop.f32.mrb[27].mxu1  ;;  %1909 = vmatprep.subr.bf16.mxu0 %v2342_v21 }
 0x396   :  { %v820_v11 = vadd.f32 %v2359_v33, %v819_v35  ;;  %1688 = vmatprep.mubr.f32.mxu0 %v856_v7 }
 0x397   :  { %1689 = vmatmul.mubr.f32.gmra.mrb[40].mxu0 %v857_v45  ;;  %v859_v56 = vmax.f32 %v825_v48, 0.0 }
 0x398   :  { %v858_v53 = vmax.f32 %v820_v11, 0.0  ;;  %v1640_v55 = vpop.f32.mrb[28].mxu1  ;;  %1911 = vmatpush3.bf16.msra.mxu0 %v2342_v21 }
 0x399   :  { %v835_v41 = vadd.f32 %v1640_v55, %v2359_v33  ;;  %v829_v47 = vpop.f32.mrb[29].mxu1  ;;  %1913 = vmatprep.subr.bf16.mxu0 %v2351_v30 }
 0x39a   :  { %v830_v9 = vadd.f32 %v2359_v33, %v829_v47  ;;  %1691 = vmatprep.mubr.f32.mxu0 %v858_v53 }
 0x39b   :  { %1692 = vmatmul.mubr.f32.gmra.mrb[42].mxu0 %v859_v56  ;;  %v861_v51 = vmax.f32 %v835_v41, 0.0 }
 0x39c   :  { %v860_v49 = vmax.f32 %v830_v9, 0.0  ;;  %v1643_v50 = vpop.f32.mrb[30].mxu1  ;;  %1915 = vmatpush3.bf16.msra.mxu0 %v2351_v30  ;;  %v1062_v30 = vld [vmem:[%s2501_s4 + $0x68] sm:$0xff] }
 0x39d   :  { %v845_v61 = vadd.f32 %v1643_v50, %v2359_v33  ;;  %v839_v62 = vpop.f32.mrb[31].mxu1  ;;  %v1916_v4 = vpack.c.bf16 %v1062_v30, %v1061_v10 }
 0x39e   :  { %v840_v21 = vadd.f32 %v2359_v33, %v839_v62  ;;  %1694 = vmatprep.mubr.f32.mxu0 %v860_v49  ;;  %v1063_v33 = vld [vmem:[%s2501_s4 + $0x70] sm:$0xff] }
 0x39f   :  { %1695 = vmatmul.mubr.f32.gmra.mrb[44].mxu0 %v861_v51  ;;  %v863_v8 = vmax.f32 %v845_v61, 0.0  ;;  %1917 = vmatprep.subr.bf16.mxu0 %v1916_v4  ;;  %v1920_v17 = vpack.c.bf16 %v1064_v6, %v1063_v33 }
 0x3a0   :  { %v862_v1 = vmax.f32 %v840_v21, 0.0  ;;  %1930 = vmatprep.subr.bf16.mxu1 %v1916_v4  ;;  %1919 = vmatpush3.bf16.msra.mxu0 %v1916_v4 }
 0x3a1   :  { %1938 = vmatpush3.bf16.msra.mxu1 %v1916_v4  ;;  %1921 = vmatprep.subr.bf16.mxu0 %v1920_v17 }
 0x3a2   :  { %1697 = vmatprep.mubr.f32.mxu0 %v862_v1  ;;  %1931 = vmatprep.subr.bf16.mxu1 %v1920_v17 }
 0x3a3   :  { %1698 = vmatmul.mubr.f32.gmra.mrb[46].mxu0 %v863_v8 }
 0x3a4   :  { %1923 = vmatpush3.bf16.msra.mxu0 %v1920_v17 }
 0x3a5   :  { %1939 = vmatpush3.bf16.msra.mxu1 %v1920_v17 }
 0x45a   :  { %v1678_v15 = vpop.f32.mrb[32].mxu0 }
 0x45b   :  { %v944_v24 = vadd.f32 %v1678_v15, %v2396_v63  ;;  %v938_v23 = vpop.f32.mrb[33].mxu0 }
 0x45c   :  { %v939_v36 = vadd.f32 %v2396_v63, %v938_v23 }
 0x45d   :  { %v1018_v29 = vadd.f32 %v944_v24, %v646_v2 }
 0x45e   :  { %v1017_v7 = vadd.f32 %v939_v36, %v645_v0  ;;  %v1681_v42 = vpop.f32.mrb[34].mxu0 }
 0x45f   :  { %v954_v45 = vadd.f32 %v1681_v42, %v2396_v63  ;;  %v948_v48 = vpop.f32.mrb[35].mxu0  ;;  %v1034_v53 = vmax.f32 %v1018_v29, 0.0 }
 0x460   :  { %v1033_v35 = vmax.f32 %v1017_v7, 0.0  ;;  %v949_v11 = vadd.f32 %v2396_v63, %v948_v48 }
 0x461   :  { %v1020_v55 = vadd.f32 %v954_v45, %v648_v16 }
 0x462   :  { %v1019_v56 = vadd.f32 %v949_v11, %v647_v18  ;;  %v1684_v41 = vpop.f32.mrb[36].mxu0  ;;  %1732 = vmatprep.mubr.f32.mxu0 %v1033_v35 }
 0x463   :  { %v964_v59 = vadd.f32 %v1684_v41, %v2396_v63  ;;  %v958_v60 = vpop.f32.mrb[37].mxu0  ;;  %1733 = vmatmul.mubr.f32.vlgmr.msra.gmra.mrb[48].mxu0 %v1034_v53  ;;  %v1036_v47 = vmax.f32 %v1020_v55, 0.0 }
 0x464   :  { %v1035_v0 = vmax.f32 %v1019_v56, 0.0  ;;  %v959_v2 = vadd.f32 %v2396_v63, %v958_v60 }
 0x465   :  { %v1022_v9 = vadd.f32 %v964_v59, %v650_v22 }
 0x466   :  { %v1021_v3 = vadd.f32 %v959_v2, %v649_v12  ;;  %v1687_v16 = vpop.f32.mrb[38].mxu0  ;;  %1735 = vmatprep.mubr.f32.mxu0 %v1035_v0 }
 0x467   :  { %v974_v5 = vadd.f32 %v1687_v16, %v2396_v63  ;;  %v968_v18 = vpop.f32.mrb[39].mxu0  ;;  %1736 = vmatmul.mubr.f32.gmra.mrb[50].mxu0 %v1036_v47  ;;  %v1038_v51 = vmax.f32 %v1022_v9, 0.0 }
 0x468   :  { %v1037_v49 = vmax.f32 %v1021_v3, 0.0  ;;  %v969_v50 = vadd.f32 %v2396_v63, %v968_v18 }
 0x469   :  { %v1024_v61 = vadd.f32 %v974_v5, %v652_v28 }
 0x46a   :  { %v1023_v13 = vadd.f32 %v969_v50, %v651_v27  ;;  %v1690_v22 = vpop.f32.mrb[40].mxu0  ;;  %1738 = vmatprep.mubr.f32.mxu0 %v1037_v49 }
 0x46b   :  { %v984_v14 = vadd.f32 %v1690_v22, %v2396_v63  ;;  %v978_v12 = vpop.f32.mrb[41].mxu0  ;;  %1739 = vmatmul.mubr.f32.gmra.mrb[52].mxu0 %v1038_v51  ;;  %v1040_v1 = vmax.f32 %v1024_v61, 0.0 }
 0x46c   :  { %v1039_v62 = vmax.f32 %v1023_v13, 0.0  ;;  %v979_v21 = vadd.f32 %v2396_v63, %v978_v12 }
 0x46d   :  { %v1026_v8 = vadd.f32 %v984_v14, %v654_v34 }
 0x46e   :  { %v1025_v19 = vadd.f32 %v979_v21, %v653_v39  ;;  %v1693_v28 = vpop.f32.mrb[42].mxu0  ;;  %1741 = vmatprep.mubr.f32.mxu1 %v1039_v62 }
 0x46f   :  { %v994_v20 = vadd.f32 %v1693_v28, %v2396_v63  ;;  %v988_v27 = vpop.f32.mrb[43].mxu0  ;;  %1742 = vmatmul.mubr.f32.vlgmr.msra.gmra.mrb[32].mxu1 %v1040_v1  ;;  %v1042_v4 = vmax.f32 %v1026_v8, 0.0 }
 0x470   :  { %v1041_v10 = vmax.f32 %v1025_v19, 0.0  ;;  %v989_v30 = vadd.f32 %v2396_v63, %v988_v27 }
 0x471   :  { %v1028_v33 = vadd.f32 %v994_v20, %v656_v40 }
 0x472   :  { %v1027_v25 = vadd.f32 %v989_v30, %v655_v52  ;;  %v1696_v34 = vpop.f32.mrb[44].mxu0  ;;  %1744 = vmatprep.mubr.f32.mxu1 %v1041_v10 }
 0x473   :  { %v1004_v26 = vadd.f32 %v1696_v34, %v2396_v63  ;;  %v998_v39 = vpop.f32.mrb[45].mxu0  ;;  %1745 = vmatmul.mubr.f32.gmra.mrb[34].mxu1 %v1042_v4  ;;  %v1044_v15 = vmax.f32 %v1028_v33, 0.0 }
 0x474   :  { %v1043_v6 = vmax.f32 %v1027_v25, 0.0  ;;  %v999_v17 = vadd.f32 %v2396_v63, %v998_v39 }
 0x475   :  { %v1030_v24 = vadd.f32 %v1004_v26, %v658_v46  ;;  %v1263_v46 = vld [vmem:[%s2502_s5] ss:$0 sm:$0xff] }
 0x476   :  { %v1029_v31 = vadd.f32 %v999_v17, %v657_v57  ;;  %v1699_v40 = vpop.f32.mrb[46].mxu0  ;;  %1747 = vmatprep.mubr.f32.mxu1 %v1043_v6 }
 0x477   :  { %v1014_v32 = vadd.f32 %v1699_v40, %v2396_v63  ;;  %v1008_v52 = vpop.f32.mrb[47].mxu0  ;;  %1748 = vmatmul.mubr.f32.gmra.mrb[36].mxu1 %v1044_v15  ;;  %v1046_v29 = vmax.f32 %v1030_v24, 0.0 }
 0x478   :  { %v1045_v23 = vmax.f32 %v1029_v31, 0.0  ;;  %v1009_v36 = vadd.f32 %v2396_v63, %v1008_v52 }
 0x479   :  { %v1032_v7 = vadd.f32 %v1014_v32, %v660_v54 }
 0x47a   :  { %v1031_v37 = vadd.f32 %v1009_v36, %v659_v58  ;;  %1750 = vmatprep.mubr.f32.mxu1 %v1045_v23 }
 0x47b   :  { %1751 = vmatmul.mubr.f32.gmra.mrb[38].mxu1 %v1046_v29  ;;  %v1048_v57 = vmax.f32 %v1032_v7, 0.0 }
 0x47c   :  { %v1047_v38 = vmax.f32 %v1031_v37, 0.0 }
 0x47e   :  { %1753 = vmatprep.mubr.f32.mxu1 %v1047_v38 }
 0x47f   :  { %1754 = vmatmul.mubr.f32.gmra.mrb[40].mxu1 %v1048_v57 }
 0x536   :  { %v1734_v42 = vpop.f32.mrb[48].mxu0 }
 0x537   :  { %v1144_v45 = vadd.f32 %v1734_v42, %v1263_v46  ;;  %v1138_v63 = vpop.f32.mrb[49].mxu0 }
 0x538   :  { %v1139_v48 = vadd.f32 %v1263_v46, %v1138_v63 }
 0x539   :  { %1218 = vst [vmem:[%s2503_s6 + $0x8] sm:$0xff] %v1144_v45 }
 0x53a   :  { %1217 = vst [vmem:[%s2503_s6] sm:$0xff] %v1139_v48  ;;  %v1737_v43 = vpop.f32.mrb[50].mxu0 }
 0x53b   :  { %v1154_v44 = vadd.f32 %v1737_v43, %v1263_v46  ;;  %v1148_v58 = vpop.f32.mrb[51].mxu0 }
 0x53c   :  { %v1149_v54 = vadd.f32 %v1263_v46, %v1148_v58 }
 0x53d   :  { %1220 = vst [vmem:[%s2503_s6 + $0x18] sm:$0xff] %v1154_v44 }
 0x53e   :  { %1219 = vst [vmem:[%s2503_s6 + $0x10] sm:$0xff] %v1149_v54  ;;  %v1740_v35 = vpop.f32.mrb[52].mxu0 }
 0x53f   :  { %v1164_v11 = vadd.f32 %v1740_v35, %v1263_v46  ;;  %v1158_v53 = vpop.f32.mrb[53].mxu0 }
 0x540   :  { %v1159_v55 = vadd.f32 %v1263_v46, %v1158_v53 }
 0x541   :  { %1222 = vst [vmem:[%s2503_s6 + $0x28] sm:$0xff] %v1164_v11 }
 0x542   :  { %1221 = vst [vmem:[%s2503_s6 + $0x20] sm:$0xff] %v1159_v55  ;;  %v1743_v56 = vpop.f32.mrb[32].mxu1 }
 0x543   :  { %v1174_v41 = vadd.f32 %v1743_v56, %v1263_v46  ;;  %v1168_v59 = vpop.f32.mrb[33].mxu1 }
 0x544   :  { %v1169_v60 = vadd.f32 %v1263_v46, %v1168_v59 }
 0x545   :  { %1224 = vst [vmem:[%s2503_s6 + $0x38] sm:$0xff] %v1174_v41 }
 0x546   :  { %1223 = vst [vmem:[%s2503_s6 + $0x30] sm:$0xff] %v1169_v60  ;;  %v1746_v0 = vpop.f32.mrb[34].mxu1 }
 0x547   :  { %v1184_v2 = vadd.f32 %v1746_v0, %v1263_v46  ;;  %v1178_v47 = vpop.f32.mrb[35].mxu1 }
 0x548   :  { %v1179_v9 = vadd.f32 %v1263_v46, %v1178_v47 }
 0x549   :  { %1226 = vst [vmem:[%s2503_s6 + $0x48] sm:$0xff] %v1184_v2 }
 0x54a   :  { %1225 = vst [vmem:[%s2503_s6 + $0x40] sm:$0xff] %v1179_v9  ;;  %v1749_v3 = vpop.f32.mrb[36].mxu1 }
 0x54b   :  { %v1194_v16 = vadd.f32 %v1749_v3, %v1263_v46  ;;  %v1188_v5 = vpop.f32.mrb[37].mxu1 }
 0x54c   :  { %v1189_v18 = vadd.f32 %v1263_v46, %v1188_v5 }
 0x54d   :  { %1228 = vst [vmem:[%s2503_s6 + $0x58] sm:$0xff] %v1194_v16 }
 0x54e   :  { %1227 = vst [vmem:[%s2503_s6 + $0x50] sm:$0xff] %v1189_v18  ;;  %v1752_v49 = vpop.f32.mrb[38].mxu1 }
 0x54f   :  { %v1204_v50 = vadd.f32 %v1752_v49, %v1263_v46  ;;  %v1198_v51 = vpop.f32.mrb[39].mxu1 }
 0x550   :  { %v1199_v61 = vadd.f32 %v1263_v46, %v1198_v51 }
 0x551   :  { %1230 = vst [vmem:[%s2503_s6 + $0x68] sm:$0xff] %v1204_v50 }
 0x552   :  { %1229 = vst [vmem:[%s2503_s6 + $0x60] sm:$0xff] %v1199_v61  ;;  %v1755_v13 = vpop.f32.mrb[40].mxu1 }
 0x553   :  { %v1214_v22 = vadd.f32 %v1755_v13, %v1263_v46  ;;  %v1208_v14 = vpop.f32.mrb[41].mxu1 }
 0x554   :  { %v1209_v12 = vadd.f32 %v1263_v46, %v1208_v14 }
 0x555   :  { %1232 = vst [vmem:[%s2503_s6 + $0x78] sm:$0xff] %v1214_v22 }
 0x556   :  { %1231 = vst [vmem:[%s2503_s6 + $0x70] sm:$0xff] %v1209_v12 }
 0x557   :  { %1237 = vsyncpa [#allocation3], 1 }

</bundles_post_ra>
